<compile_context>
chip_gen: v7x
topology: tpu7x:2x2x1
jax: 0.10.0
libtpu: 0.0.40
codegen_flags: <defaults>
</compile_context>

<pallas_src>
import math

import jax
import jax.numpy as jnp
from jax.experimental import pallas as pl
from jax.experimental.pallas import tpu as pltpu

_LANES = 128
_VMEM_TILE_BUDGET = 12 * 1024 * 1024   # conservative: fits v5e 16 MiB scoped default,
                                       # v6e 32 MiB scoped, v7x 32 MiB scoped / 64 MiB phys
_SMALL_INPUT_BYTES = 2 * 1024 * 1024   # below this, XLA fusion beats a custom call


def _make_sum_kernel(n, weighted):
    """Kernel: (w_smem_ref, x0_ref, ..., x{n-1}_ref, o_ref)."""

    def kernel(w_ref, *refs):
        x_refs = refs[:n]
        o_ref = refs[n]
        acc = x_refs[0][...].astype(jnp.float32)
        for i in range(n - 1):  # n static -> unrolled VPU fma chain
            xi = x_refs[i + 1][...].astype(jnp.float32)
            acc = acc + (xi * w_ref[i] if weighted else xi)
        o_ref[...] = acc.astype(o_ref.dtype)

    return kernel


def _round_up(x, m):
    return ((x + m - 1) // m) * m


def _pick_tile(R, n, dtype_bytes, sublane):
    """Largest sublane-aligned row tile fitting the double-buffered VMEM budget
    (cap 2048 rows). No divisibility requirement: the grid over-covers R and the
    final partial block is masked by Pallas. Guarantees >= 2 grid steps whenever R
    allows it so `parallel` can shard across both v7x TensorCores."""
    max_tile_vmem = _VMEM_TILE_BUDGET // (2 * (n + 1) * _LANES * dtype_bytes)
    tile = min(2048, max_tile_vmem)
    tile = max(sublane, (tile // sublane) * sublane)
    tile = min(tile, _round_up(R, sublane))          # never allocate past the array
    if tile >= R and R > sublane:                    # force >= 2 steps (v7x megacore)
        tile = _round_up((R + 1) // 2, sublane)
    return tile


def sum_fusion(xs, w_param=None, *, min_pallas_bytes=_SMALL_INPUT_BYTES):
    """Weighted sum of a list of same-shape tensors (Pallas TPU kernel).

    xs:       list of n arrays (any shape, e.g. NCHW), same shape/dtype
    w_param:  optional (n-1,) raw parameter; effective weights = sigmoid(w)*2,
              else implicit all-ones (plain sum).
    """
    n = len(xs)
    assert n >= 2
    shape = xs[0].shape
    out_dtype = xs[0].dtype
    dtype_bytes = jnp.dtype(out_dtype).itemsize
    sublane = max(8, 32 // dtype_bytes)  # f32: 8, bf16: 16, int8/fp8: 32

    weighted = w_param is not None
    # parameter-setup glue (sigmoid on (n-1) scalars) stays in plain JAX
    if weighted:
        w_eff = jax.nn.sigmoid(w_param.astype(jnp.float32)) * 2.0
    else:
        w_eff = jnp.ones((n - 1,), dtype=jnp.float32)

    total = math.prod(shape)

    # ---- small-input fast path: custom-call + per-step overhead would dominate ----
    if (n + 1) * total * dtype_bytes < min_pallas_bytes:
        acc = xs[0].astype(jnp.float32)
        for i in range(n - 1):
            xi = xs[i + 1].astype(jnp.float32)
            acc = acc + (xi * w_eff[i] if weighted else xi)
        return acc.astype(out_dtype)

    # ---- Pallas path ----
    # Lane pad only when strictly needed for the (R, 128) flat view; row remainders
    # are handled by the over-covering cdiv grid (no pad / slice copies for aligned sizes).
    total_p = _round_up(total, _LANES)
    R = total_p // _LANES
    flats = []
    for x in xs:
        xf = x.reshape(-1)
        if total_p != total:
            xf = jnp.pad(xf, (0, total_p - total))
        flats.append(xf.reshape(R, _LANES))

    tile = _pick_tile(R, n, dtype_bytes, sublane)
    grid = (pl.cdiv(R, tile),)

    # double-buffered blocks (n inputs + 1 output) + headroom for internal scratch
    footprint = 2 * (n + 1) * tile * _LANES * dtype_bytes
    vmem_limit = int(min(footprint + 8 * 1024 * 1024, 30 * 1024 * 1024))

    kernel = _make_sum_kernel(n, weighted)
    spec = pl.BlockSpec((tile, _LANES), lambda r, w: (r, 0))

    out_flat = pl.pallas_call(
        kernel,
        out_shape=jax.ShapeDtypeStruct((R, _LANES), out_dtype),
        grid_spec=pltpu.PrefetchScalarGridSpec(
            num_scalar_prefetch=1,      # w_eff -> SMEM, passed to index_maps
            grid=grid,
            in_specs=[spec] * n,        # n independent, double-buffered input streams
            out_specs=spec,
        ),
        compiler_params=pltpu.CompilerParams(
            dimension_semantics=("parallel",),
            vmem_limit_bytes=vmem_limit,
        ),
        cost_estimate=pl.CostEstimate(
            flops=(2 if weighted else 1) * (n - 1) * total,
            transcendentals=0,
            bytes_accessed=(n + 1) * total_p * dtype_bytes,
        ),
    )(w_eff, *flats)

    out = out_flat.reshape(-1)
    if total_p != total:
        out = out[:total]
    return out.reshape(shape)


if __name__ == "__main__":
    key = jax.random.PRNGKey(0)
    n = 3
    B, C, H, W = 2, 4, 16, 16  # NCHW, matches PyTorch conv-style inputs

    keys = jax.random.split(key, n)
    xs = [jax.random.normal(keys[i], (B, C, H, W), dtype=jnp.float32) for i in range(n)]

    # deterministic parameter init, exactly as in the module: -arange(1.0, n) / 2
    w_param = -jnp.arange(1.0, float(n), dtype=jnp.float32) / 2.0
    w_eff = jax.nn.sigmoid(w_param) * 2.0

    # plain-JAX references
    ref_w = xs[0]
    ref_p = xs[0]
    for i in range(n - 1):
        ref_w = ref_w + xs[i + 1] * w_eff[i]
        ref_p = ref_p + xs[i + 1]

    # 1) Pallas path (forced, min_pallas_bytes=0): weighted and plain sums
    y_w = sum_fusion(xs, w_param, min_pallas_bytes=0)
    y_p = sum_fusion(xs, None, min_pallas_bytes=0)
    jax.block_until_ready(y_w)
    jax.block_until_ready(y_p)
    assert y_w.shape == (B, C, H, W)
    assert jnp.allclose(y_w, ref_w, atol=1e-5, rtol=1e-5)
    assert jnp.allclose(y_p, ref_p, atol=1e-5, rtol=1e-5)

    # 2) default path: this shape is tiny -> small-input fast path, same numbers
    y_fast = sum_fusion(xs, w_param)
    jax.block_until_ready(y_fast)
    assert jnp.allclose(y_fast, ref_w, atol=1e-5, rtol=1e-5)

    # 3) non-128-aligned total exercises the minimal lane pad + partial last row block
    xs_odd = [jax.random.normal(keys[i], (2, 3, 15, 15), dtype=jnp.float32) for i in range(n)]
    ref_odd = xs_odd[0]
    for i in range(n - 1):
        ref_odd = ref_odd + xs_odd[i + 1] * w_eff[i]
    y_odd = sum_fusion(xs_odd, w_param, min_pallas_bytes=0)
    jax.block_until_ready(y_odd)
    assert jnp.allclose(y_odd, ref_odd, atol=1e-5, rtol=1e-5)

    # 4) bf16 I/O path (halved HBM traffic; f32 accumulation inside the kernel)
    xs_bf = [x.astype(jnp.bfloat16) for x in xs]
    y_bf = sum_fusion(xs_bf, w_param, min_pallas_bytes=0)
    jax.block_until_ready(y_bf)
    ref_bf = xs_bf[0].astype(jnp.float32)
    for i in range(n - 1):
        ref_bf = ref_bf + xs_bf[i + 1].astype(jnp.float32) * w_eff[i]
    assert y_bf.dtype == jnp.bfloat16
    assert jnp.allclose(y_bf.astype(jnp.float32), ref_bf, atol=3e-2, rtol=3e-2)

    print("KERNEL_OK")
</pallas_src>

<mosaic_0001>
module attributes {stable_mosaic.version = 11 : i64} {
  func.func @kernel(%arg0: i32, %arg1: memref<2xf32, #tpu.memory_space<smem>>, %arg2: memref<8x128xf32, #tpu.memory_space<vmem>>, %arg3: memref<8x128xf32, #tpu.memory_space<vmem>>, %arg4: memref<8x128xf32, #tpu.memory_space<vmem>>, %arg5: memref<8x128xf32, #tpu.memory_space<vmem>>) attributes {dimension_semantics = [#tpu.dimension_semantics<parallel>], iteration_bounds = array<i64: 2>, scalar_prefetch = 1 : i64, scratch_operands = 0 : i64, tpu.core_type = #tpu.core_type<tc>, window_params = [{transform_indices = @transform_0, window_bounds = array<i64: 8, 128>}, {transform_indices = @transform_1, window_bounds = array<i64: 8, 128>}, {transform_indices = @transform_2, window_bounds = array<i64: 8, 128>}, {transform_indices = @transform_3, window_bounds = array<i64: 8, 128>}]} {
    %c0 = arith.constant 0 : index
    %c0_0 = arith.constant 0 : index
    %0 = vector.load %arg2[%c0, %c0_0] : memref<8x128xf32, #tpu.memory_space<vmem>>, vector<8x128xf32>
    %c0_1 = arith.constant 0 : index
    %c0_2 = arith.constant 0 : index
    %1 = vector.load %arg3[%c0_1, %c0_2] : memref<8x128xf32, #tpu.memory_space<vmem>>, vector<8x128xf32>
    %c0_3 = arith.constant 0 : index
    %2 = memref.load %arg1[%c0_3] : memref<2xf32, #tpu.memory_space<smem>>
    %3 = vector.broadcast %2 : f32 to vector<8x128xf32>
    %4 = arith.mulf %1, %3 : vector<8x128xf32>
    %5 = arith.addf %0, %4 : vector<8x128xf32>
    %c0_4 = arith.constant 0 : index
    %c0_5 = arith.constant 0 : index
    %6 = vector.load %arg4[%c0_4, %c0_5] : memref<8x128xf32, #tpu.memory_space<vmem>>, vector<8x128xf32>
    %c1 = arith.constant 1 : index
    %7 = memref.load %arg1[%c1] : memref<2xf32, #tpu.memory_space<smem>>
    %8 = vector.broadcast %7 : f32 to vector<8x128xf32>
    %9 = arith.mulf %6, %8 : vector<8x128xf32>
    %10 = arith.addf %5, %9 : vector<8x128xf32>
    %c0_6 = arith.constant 0 : index
    %c0_7 = arith.constant 0 : index
    %11 = vector.load %arg5[%c0_6, %c0_7] : memref<8x128xf32, #tpu.memory_space<vmem>>, vector<8x128xf32>
    tpu.vector_store %arg5[%c0_6, %c0_7], %10 {strides = array<i32>} : memref<8x128xf32, #tpu.memory_space<vmem>>, vector<8x128xf32>,
    return
  }
  func.func @transform_0(%arg0: i32, %arg1: memref<2xf32, #tpu.memory_space<smem>>) -> (i32, i32) {
    %c0_i32 = arith.constant 0 : i32
    %c0_i32_0 = arith.constant 0 : i32
    return %arg0, %c0_i32 : i32, i32
  }
  func.func @transform_1(%arg0: i32, %arg1: memref<2xf32, #tpu.memory_space<smem>>) -> (i32, i32) {
    %c0_i32 = arith.constant 0 : i32
    %c0_i32_0 = arith.constant 0 : i32
    return %arg0, %c0_i32 : i32, i32
  }
  func.func @transform_2(%arg0: i32, %arg1: memref<2xf32, #tpu.memory_space<smem>>) -> (i32, i32) {
    %c0_i32 = arith.constant 0 : i32
    %c0_i32_0 = arith.constant 0 : i32
    return %arg0, %c0_i32 : i32, i32
  }
  func.func @transform_3(%arg0: i32, %arg1: memref<2xf32, #tpu.memory_space<smem>>) -> (i32, i32) {
    %c0_i32 = arith.constant 0 : i32
    %c0_i32_0 = arith.constant 0 : i32
    return %arg0, %c0_i32 : i32, i32
  }
}

</mosaic_0001>

<bundles_post_ra>
// kernel: tpu_custom_call.1
= control target key start
LH: loop header
LB: loop body
LE: loop exit
PB: predicated region body
PF: predicated region fallthrough
CT: control target
= control target key end

     0   :  { %s922_s0 = inlined_call_operand.hbm [shape: f32[2], index: 0, kind: input, shape index: {}]   ;;  %s923_s1 = inlined_call_operand.hbm [shape: f32[16,128], index: 1, kind: input, shape index: {}]   ;;  %s924_s2 = inlined_call_operand.hbm [shape: f32[16,128], index: 2, kind: input, shape index: {}]   ;;  %s925_s3 = inlined_call_operand.hbm [shape: f32[16,128], index: 3, kind: input, shape index: {}]   ;;  %s926_s4 = inlined_call_operand.hbm [shape: f32[16,128], index: 4, kind: output, shape index: {}]  }
   0x1   :  { %931 = sst [smem:[#allocation15_spill]] %s924_s2  ;;  %s477_s17 = scalar_lea.hbm %s922_s0, 16 }
   0x2   :  { %p478_p0 = scmp.ne.s32.totalorder %s922_s0, %s477_s17  ;;  %p481_p1 = scmp.lt.u32.totalorder %s477_s17, %s922_s0 }
   0x4   :  { %p483_p2 = pnand %p481_p1, %p478_p0 }
   0x6   :  { %486 = shalt.err (!%p483_p2)  }
   0x7   :  { %s651_s22 = smov [#allocation3]  }
   0x8   :  { %10 = dma.hbm_to_smem %s922_s0, 16, %s651_s22, [#allocation2] }
   0x9   :  { %621 = dma.done.wait [#allocation2], 16 }
   0xa   :  { %622 = vsyncadd [#allocation2], 4294967280 }
   0xb   :  { %12 = sfence }
   0xc   :  { %13 = vsyncpa [#allocation5], 0 }
   0xd   :  { %15 = vsyncpa [#allocation5 + $0x1], 0 }
   0xe   :  { %16 = vsyncpa [#allocation8], 0 }
   0xf   :  { %18 = vsyncpa [#allocation8 + $0x1], 0 }
  0x10   :  { %19 = vsyncpa [#allocation6], 0 }
  0x11   :  { %21 = vsyncpa [#allocation6 + $0x1], 0  ;;  %s693_s25 = smov 0   ;;  %s695_s26 = smov 0  }
  0x12   :  { %s697_s27 = smov 0   ;;  %s699_s28 = smov 0  }
  0x13 LB: > { %s714_s0 = sadd.s32 4294967295, %s649_s28   ;;  %s401_s29 = sadd.s32 4294967294, %s649_s28   ;;  %s649_s28 = sphi %s699_s28, %s950_s28   ;;  %s645_s27 = sphi %s697_s27, %s949_s27   ;;  %s641_s26 = sphi %s695_s26, %s948_s26   ;;  %s637_s25 = sphi %s693_s25, %s947_s25  }
  0x14   : > { %s718_s30 = sadd.s32 1, %s649_s28   ;;  %s34_s5 = sadd.s32 1, %s645_s27 }
  0x15   : > { %s31_s6 = ssub.s32 %s649_s28, %s718_s30  ;;  %p41_p3 = scmp.ne.s32.totalorder %s645_s27, %s641_s26 }
  0x16   : > { %p32_p4 = scmp.eq.s32.totalorder %s31_s6, 0  ;;  %p42_p5 = scmp.eq.s32.totalorder %s649_s28, 0 }
  0x17   : > { %p47_p6 = scmp.ne.s32.totalorder %s641_s26, %s637_s25  ;;  %p48_p7 = scmp.eq.s32.totalorder %s714_s0, 0 }
  0x18   : > { %s730_s7 = scalar_select %p32_p4, %s645_s27, %s34_s5  }
  0x19   : > { %p43_p8 = por %p42_p5, %p41_p3  ;;  %p732_p9 = por %p48_p7, %p47_p6 }
  0x1a   : > { %p123_p10 = scmp.eq.s32.totalorder %s714_s0, 1  ;;  %p129_p11 = scmp.eq.s32.totalorder %s401_s29, 1 }
  0x1b   : > { %s932_s8 = scalar_select %p732_p9, 1, 0 }
  0x1c   : > { %p442_p13 = scmp.lt.s32.totalorder %s649_s28, 2  ;;  %p739_p0 = por %p123_p10, %p41_p3 }
  0x1d   : > { %p743_p1 = por %p129_p11, %p47_p6  ;;  %s149_s11 = sand.u32 1, %s645_s27  }
  0x1e   : > { %s933_s9 = scalar_select %p739_p0, 1, 0 }
  0x1f   : > { %s934_s10 = scalar_select %p743_p1, 1, 0 }
  0x20   : > { %s749_s12 = sshll.u32 %s649_s28, 7  ;;  %s753_s13 = sshll.u32 %s149_s11, 3 }
  0x21   : > { %p755_p2 = pnand %p442_p13, %p43_p8  ;;  %s167_s15 = sand.u32 1, %s649_s28  }
  0x22   : > { %s936_s2 = sld [smem:[#allocation15_spill]]  ;;  %s171_s19 = scalar_lea.vmem [#allocation7], %s753_s13 }
  0x23   : > { %s935_s14 = scalar_select %p755_p2, 1, 0 }
  0x24   : > { %s178_s20 = sshll.u32 %s171_s19, 4  ;;  %s770_s21 = scalar_lea.sflag [#allocation8], %s167_s15  ;;  %s767_s20 = int_to_ptr.vmem [resolvable:$true] %s178_s20 }
  0x25   : > { %p776_p5 = pneg %p755_p2 }
  0x28   : > { %s764_s18 = scalar_lea.hbm %s936_s2, %s749_s12  ;;  %s492_s5 = scalar_lea.hbm %s936_s2, 256 }
  0x29   : > { %s487_s22 = scalar_lea.hbm %s764_s18, 128  ;;  %p493_p8 = scmp.lt.u32.totalorder %s764_s18, %s936_s2 }
  0x2a   : > { %p488_p4 = scmp.ne.s32.totalorder %s764_s18, %s487_s22  ;;  %p494_p10 = scmp.lt.u32.totalorder %s492_s5, %s487_s22 }
  0x2b   : > { %p496_p13 = scmp.lt.u32.totalorder %s487_s22, %s764_s18 }
  0x2c   : > { %p490_p6 = pnand %p776_p5, %p488_p4  ;;  %p495_p11 = por %p494_p10, %p493_p8 }
  0x2e   : > { %p491_p7 = pneg %p490_p6  ;;  %p497_p12 = por %p496_p13, %p495_p11 }
  0x30   : > { %p498_p3 = pnand %p497_p12, %p491_p7 }
  0x32   : > { %501 = shalt.err (!%p498_p3)
}
  0x33   : > { %s502_s15 = scalar_lea.vmem %s767_s20, 128  ;;  %s652_s17 = smov [#allocation7]  }
  0x34   : > { %p503_p4 = scmp.ne.s32.totalorder %s767_s20, %s502_s15  ;;  %s507_s19 = sshll.u32 %s652_s17, 4  ;;  %s508_s19 = int_to_ptr.vmem [resolvable:$false] %s507_s19 }
  0x35   : > { %s509_s24 = scalar_lea.vmem %s508_s19, 256  ;;  %p510_p0 = scmp.lt.s32.totalorder %s767_s20, %s508_s19 }
  0x36   : > { %p505_p6 = pnand %p503_p4, %p776_p5  ;;  %p511_p9 = scmp.lt.s32.totalorder %s509_s24, %s502_s15 }
  0x38   : > { %p506_p1 = pneg %p505_p6  ;;  %p512_p8 = por %p511_p9, %p510_p0 }
  0x3a   : > { %p513_p10 = pnand %p512_p8, %p506_p1 }
  0x3c   : > { %516 = shalt.err (!%p513_p10)
}
  0x3d   : > { %434 = dma.hbm_to_vmem [thread:$0]  (!%p755_p2), %s764_s18, 128, %s767_s20, %s770_s21  }
  0x3e   : > { %p201_p12 = scmp.lt.s32.totalorder %s649_s28, 3  ;;  %s805_s5 = scalar_lea.hbm %s923_s1, %s749_s12 }
  0x3f   : > { %p938_p9 = scmp.ge.s32.totalorder %s649_s28, 1  ;;  %s153_s16 = scalar_lea.vmem [#allocation4], %s753_s13 }
  0x40   : > { %s160_s15 = sshll.u32 %s153_s16, 4  ;;  %s150_s18 = scalar_lea.sflag [#allocation5], %s149_s11  ;;  %s161_s15 = int_to_ptr.vmem [resolvable:$true] %s160_s15 }
  0x41   : > { %p809_p0 = pnand %p938_p9, %p201_p12  ;;  %s517_s20 = scalar_lea.hbm %s805_s5, 128 }
  0x42   : > { %p518_p1 = scmp.ne.s32.totalorder %s805_s5, %s517_s20  ;;  %s522_s24 = scalar_lea.hbm %s923_s1, 256 }
  0x43   : > { %s939_s6 = scalar_select %p809_p0, 1, 0 }
  0x44   : > { %p520_p3 = pnand %p518_p1, %p776_p5  ;;  %p523_p11 = scmp.lt.u32.totalorder %s805_s5, %s923_s1 }
  0x45   : > { %p524_p13 = scmp.lt.u32.totalorder %s522_s24, %s517_s20  ;;  %p526_p6 = scmp.lt.u32.totalorder %s517_s20, %s805_s5 }
  0x46   : > { %p521_p7 = pneg %p520_p3 }
  0x47   : > { %p525_p4 = por %p524_p13, %p523_p11 }
  0x49   : > { %p527_p8 = por %p526_p6, %p525_p4 }
  0x4b   : > { %p528_p10 = pnand %p527_p8, %p521_p7 }
  0x4d   : > { %531 = shalt.err (!%p528_p10)
}
  0x4e   : > { %s532_s11 = scalar_lea.vmem %s161_s15, 128  ;;  %s653_s16 = smov [#allocation4]  }
  0x4f   : > { %p533_p12 = scmp.ne.s32.totalorder %s161_s15, %s532_s11  ;;  %s537_s2 = sshll.u32 %s653_s16, 4  ;;  %s538_s2 = int_to_ptr.vmem [resolvable:$false] %s537_s2 }
  0x50   : > { %s539_s17 = scalar_lea.vmem %s538_s2, 256  ;;  %p540_p3 = scmp.lt.s32.totalorder %s161_s15, %s538_s2 }
  0x51   : > { %p535_p9 = pnand %p533_p12, %p776_p5  ;;  %p541_p0 = scmp.lt.s32.totalorder %s539_s17, %s532_s11 }
  0x53   : > { %p536_p1 = pneg %p535_p9  ;;  %p542_p2 = por %p541_p0, %p540_p3 }
  0x55   : > { %p543_p11 = pnand %p542_p2, %p536_p1 }
  0x57   : > { %546 = shalt.err (!%p543_p11)
}
  0x58   : > { %p940_p13 = scmp.ne.s32.totalorder %s935_s14, 0  ;;  %s837_s24 = scalar_lea.hbm %s925_s3, %s749_s12 }
  0x59   : > { %s189_s2 = scalar_lea.vmem [#allocation9], %s753_s13  ;;  %s547_s29 = scalar_lea.hbm %s837_s24, 128 }
  0x5a   : > { %431 = dma.hbm_to_vmem [thread:$0]  (!%p940_p13), %s805_s5, 128, %s161_s15, %s150_s18  }
  0x5b   : > { %s196_s22 = sshll.u32 %s189_s2, 4  ;;  %p548_p2 = scmp.ne.s32.totalorder %s837_s24, %s547_s29  ;;  %s197_s22 = int_to_ptr.vmem [resolvable:$true] %s196_s22 }
  0x5c   : > { %s552_s5 = scalar_lea.hbm %s925_s3, 256  ;;  %p553_p4 = scmp.lt.u32.totalorder %s837_s24, %s925_s3 }
  0x5d   : > { %p550_p0 = pnand %p548_p2, %p776_p5  ;;  %p554_p6 = scmp.lt.u32.totalorder %s552_s5, %s547_s29 }
  0x5e   : > { %p556_p10 = scmp.lt.u32.totalorder %s547_s29, %s837_s24 }
  0x5f   : > { %p551_p7 = pneg %p550_p0  ;;  %p555_p8 = por %p554_p6, %p553_p4 }
  0x61   : > { %p557_p12 = por %p556_p10, %p555_p8 }
  0x63   : > { %p558_p9 = pnand %p557_p12, %p551_p7 }
  0x65   : > { %561 = shalt.err (!%p558_p9)
}
  0x66   : > { %s562_s12 = scalar_lea.vmem %s197_s22, 128  ;;  %s654_s13 = smov [#allocation9]  }
  0x67   : > { %p563_p1 = scmp.ne.s32.totalorder %s197_s22, %s562_s12  ;;  %s567_s17 = sshll.u32 %s654_s13, 4  ;;  %s568_s17 = int_to_ptr.vmem [resolvable:$false] %s567_s17 }
  0x68   : > { %s569_s20 = scalar_lea.vmem %s568_s17, 256  ;;  %p570_p2 = scmp.lt.s32.totalorder %s197_s22, %s568_s17 }
  0x69   : > { %p565_p3 = pnand %p563_p1, %p776_p5  ;;  %p571_p0 = scmp.lt.s32.totalorder %s569_s20, %s562_s12 }
  0x6b   : > { %p566_p11 = pneg %p565_p3  ;;  %p572_p13 = por %p571_p0, %p570_p2 }
  0x6d   : > { %p573_p4 = pnand %p572_p13, %p566_p11 }
  0x6f   : > { %576 = shalt.err (!%p573_p4)
}
  0x70   : > { %p941_p6 = scmp.ne.s32.totalorder %s935_s14, 0  ;;  %p942_p7 = scmp.ne.s32.totalorder %s939_s6, 0 }
  0x71   : > { %s861_s23 = sand.u32 (!%p942_p7), 1, %s641_s26   ;;  %p943_p5 = scmp.ne.s32.totalorder (!%p942_p7), %s932_s8, 0 }
  0x72   : > { %437 = dma.hbm_to_vmem [thread:$0]  (!%p941_p6), %s837_s24, 128, %s197_s22, %s770_s21  }
  0x73   : > { %205 = sbr.rel (%p942_p7) target bundleno = 153 (0x99), region = 32  ;;  %s411_s19 = sshll.u32 (!%p942_p7), %s861_s23, 3 }
  0x74   : > { %s208_s2 = scalar_lea.sflag (!%p942_p7), [#allocation5], %s861_s23  ;;  %s211_s29 = scalar_lea.vmem (!%p942_p7), [#allocation4], %s411_s19 }
  0x7a   : > { %624 = dma.done.wait (%p943_p5), %s208_s2, 128  }
  0x7b   : > { %626 = vsyncadd (%p943_p5), %s208_s2, 4294967168  ;;  %s216_s14 = sand.u32 1, %s714_s0   ;;  %s220_s6 = scalar_lea.vmem [#allocation7], %s411_s19 }
  0x7c   : > { %s217_s21 = scalar_lea.sflag [#allocation8], %s216_s14 }
  0x7d   : > { %628 = dma.done.wait (%p943_p5), %s217_s21, 256  }
  0x7e   : > { %630 = vsyncadd (%p943_p5), %s217_s21, 4294967040  ;;  %s264_s24 = sld [smem:[#allocation3]]  ;;  %s415_s22 = sld [smem:[#allocation3 + $0x1]]  ;;  %v262_v0 = vld [vmem:[%s211_s29] sm:$0xff]  ;;  %v263_v1 = vld [vmem:[%s220_s6] sm:$0xff] }
  0x7f   : > { %s229_s11 = scalar_lea.vmem [#allocation9], %s411_s19  ;;  %s261_s16 = scalar_lea.vmem [#allocation10], %s411_s19 }
  0x80   : > { %v268_v3 = vld [vmem:[%s229_s11] sm:$0xff]  ;;  %s288_s5 = sshll.u32 %s261_s16, 4  ;;  %s417_s15 = sshll.u32 %s714_s0, 7  ;;  %s875_s5 = int_to_ptr.vmem [resolvable:$true] %s288_s5 }
  0x81   : > { %s880_s12 = scalar_lea.hbm %s926_s4, %s417_s15  ;;  %s275_s13 = scalar_lea.sflag [#allocation6], %s861_s23 }
  0x82   : > { %s577_s17 = scalar_lea.vmem %s875_s5, 128  ;;  %p944_p8 = scmp.ne.s32.totalorder %s933_s9, 0 }
  0x83   : > { %p578_p13 = scmp.ne.s32.totalorder %s875_s5, %s577_s17  ;;  %s655_s0 = smov [#allocation10]  }
  0x84   : > { %v265_v2 = vstv %s264_s24  ;;  %v270_v5 = vstv %s415_s22  ;;  %s581_s20 = sshll.u32 %s655_s0, 4  ;;  %s582_s20 = int_to_ptr.vmem [resolvable:$false] %s581_s20 }
  0x85   : > { %v266_v4 = vmul.f32 %v265_v2, %v263_v1  ;;  %v271_v6 = vmul.f32 %v270_v5, %v268_v3  ;;  %p579_p10 = pnand %p578_p13, %p944_p8  ;;  %s583_s19 = scalar_lea.vmem %s582_s20, 256 }
  0x86   : > { %p584_p9 = scmp.lt.s32.totalorder %s875_s5, %s582_s20  ;;  %p585_p1 = scmp.lt.s32.totalorder %s583_s19, %s577_s17 }
  0x87   : > { %v267_v7 = vadd.f32 %v266_v4, %v262_v0  ;;  %p580_p12 = pneg %p579_p10 }
  0x88   : > { %p586_p3 = por %p585_p1, %p584_p9 }
  0x89   : > { %v272_v8 = vadd.f32 %v271_v6, %v267_v7 }
  0x8a   : > { %p587_p11 = pnand %p586_p3, %p580_p12 }
  0x8b   : > { %273 = vst [vmem:[%s261_s16] sm:$0xff] %v272_v8 }
  0x8c   : > { %590 = shalt.err (!%p587_p11)
}
  0x8d   : > { %s591_s23 = scalar_lea.hbm %s880_s12, 128  ;;  %s595_s14 = scalar_lea.hbm %s926_s4, 256 }
  0x8e   : > { %p592_p2 = scmp.ne.s32.totalorder %s880_s12, %s591_s23  ;;  %p596_p6 = scmp.lt.u32.totalorder %s880_s12, %s926_s4 }
  0x8f   : > { %p597_p7 = scmp.lt.u32.totalorder %s595_s14, %s591_s23  ;;  %p599_p13 = scmp.lt.u32.totalorder %s591_s23, %s880_s12 }
  0x90   : > { %p593_p0 = pnand %p592_p2, %p944_p8 }
  0x91   : > { %p598_p5 = por %p597_p7, %p596_p6 }
  0x92   : > { %p594_p4 = pneg %p593_p0 }
  0x93   : > { %p600_p10 = por %p599_p13, %p598_p5 }
  0x95   : > { %p601_p12 = pnand %p600_p10, %p594_p4 }
  0x97   : > { %604 = shalt.err (!%p601_p12)
}
  0x98   : > { %426 = dma.vmem_to_hbm [thread:$0]  (%p944_p8), %s875_s5, 128, %s880_s12, %s275_s13  }
  0x99 PF: > { %s300_s24 = sand.u32 1, %s637_s25   ;;  %p945_p9 = scmp.ne.s32.totalorder %s934_s10, 0 }
  0x9a   : > { %p946_p1 = scmp.ge.s32.totalorder %s649_s28, 2  ;;  %s301_s22 = scalar_lea.sflag [#allocation6], %s300_s24 }
  0x9c   : > { %p439_p3 = pnand %p946_p1, %p945_p9 }
  0x9e   : > { %632 = dma.done.wait (!%p439_p3), %s301_s22, 128  }
  0x9f   : > { %634 = vsyncadd (!%p439_p3), %s301_s22, 4294967168  ;;  %p24_p11 = scmp.ge.s32.totalorder %s718_s30, 4   ;;  %s947_s25 = smov %s641_s26 }
  0xa0   : > { %s948_s26 = smov %s645_s27  ;;  %s949_s27 = smov %s730_s7 }
  0xa1   : > { %s950_s28 = smov %s718_s30  ;;  %26 = sbr.rel (!%p24_p11) target bundleno = 19 (0x13), region = 101 }
  0xa8   :  { %306 = vsyncpa [#allocation5], 1 }
  0xa9   :  { %308 = vsyncpa [#allocation5 + $0x1], 1 }
  0xaa   :  { %309 = vsyncpa [#allocation8], 1 }
  0xab   :  { %311 = vsyncpa [#allocation8 + $0x1], 1 }
  0xac   :  { %312 = vsyncpa [#allocation6], 1 }
  0xad   :  { %314 = vsyncpa [#allocation6 + $0x1], 1 }

</bundles_post_ra>
